<compile_context>
chip_gen: v6e
topology: v6e:2x2x1
jax: 0.10.0
libtpu: 0.0.40
codegen_flags: <defaults>
</compile_context>

<pallas_src>
import functools

import numpy as np
import jax
import jax.numpy as jnp
from jax import lax
from jax.experimental import pallas as pl
from jax.experimental.pallas import tpu as pltpu


def _round_up(x, m):
    return (x + m - 1) // m * m


def make_first_layers_params(key, emb_dims):
    """Deterministic embedding tables, shapes from emb_dims = [(vocab, dim), ...]."""
    tables = []
    for i, (v, d) in enumerate(emb_dims):
        k = jax.random.fold_in(key, i)
        tables.append(jax.random.normal(k, (v, d), dtype=jnp.float32) * 0.02)
    return tables


def make_first_layers_state(emb_tables, no_of_cont, *, dot_dtype=jnp.bfloat16):
    """Precompute the fused gather weight ONCE (host-side numpy, single device put).

    Combined weight layout (one MXU pass does gather + cont pass-through):
      LHS  = [cont | one-hot(ids + prefix offsets)]            [TB, K]
      W    = rows 0..nc-1 : identity mapping cont -> tail cols [K, total]
             rows nc..    : block-diagonal embedding tables
      OUT  = LHS @ W = [emb_0 | ... | emb_{n-1} | cont]        [TB, total]
    """
    vocabs = [int(t.shape[0]) for t in emb_tables]
    dims = [int(t.shape[1]) for t in emb_tables]
    nc = int(no_of_cont)
    sum_dim = sum(dims)
    total = sum_dim + nc
    k_total = nc + sum(vocabs)

    w = np.zeros((k_total, total), dtype=np.float32)
    for j in range(nc):                          # cont pass-through identity block
        w[j, sum_dim + j] = 1.0
    voff, doff, offsets = nc, 0, []
    for t, v, d in zip(emb_tables, vocabs, dims):
        w[voff:voff + v, doff:doff + d] = np.asarray(t, dtype=np.float32)
        offsets.append(voff)                     # offsets already include +nc shift
        voff += v
        doff += d

    return dict(
        w=jnp.asarray(w, dtype=dot_dtype),
        vocab_offsets=tuple(offsets),
        n_cat=len(emb_tables),
        no_of_cont=nc,
        sum_dim=sum_dim,
        total=total,
        k_total=k_total,
        dot_dtype=dot_dtype,
    )


def _first_layers_kernel(*refs, vocab_offsets, k_total, no_of_cont, dot_dtype):
    if no_of_cont:
        cat_ref, cont_ref, w_ref, out_ref = refs
    else:
        cat_ref, w_ref, out_ref = refs
    tb = out_ref.shape[0]

    # One hoisted iota; per-feature integer compare, boolean OR accumulation.
    cat = cat_ref[...]                                              # [TB, n_cat] int32
    iota = lax.broadcasted_iota(jnp.int32, (tb, k_total), 1)        # [TB, K]
    hit = (cat[:, 0:1] + vocab_offsets[0]) == iota
    for i in range(1, len(vocab_offsets)):
        hit = hit | ((cat[:, i:i + 1] + vocab_offsets[i]) == iota)

    # LHS lanes 0..nc-1 carry cont (native lane position, no shuffle of real data),
    # lanes nc.. carry the combined one-hot; the supports are disjoint.
    if no_of_cont:
        fill = jnp.concatenate(
            [cont_ref[...],
             jnp.zeros((tb, k_total - no_of_cont), dtype=jnp.float32)],
            axis=1)
    else:
        fill = jnp.zeros((tb, k_total), dtype=jnp.float32)
    lhs = jnp.where(hit, jnp.float32(1.0), fill).astype(dot_dtype)  # single cast

    # One fused MXU pass (bf16 operands, f32 accumulation). The result is already
    # the final [TB, total] row (embeddings | cont): one lane-contiguous store,
    # no concatenate / zero-pad on the output path.
    # emb_dropout_layer: identity in eval mode.
    out_ref[...] = jnp.dot(lhs, w_ref[...], preferred_element_type=jnp.float32)


def _vmem_cap_bytes():
    # Generation-aware scoped-VMEM cap: ~3/4 of physical, <=100 MiB on the 128 MiB
    # parts (v5e/v6e), ~48 MiB on v7x (64 MiB physical).
    try:
        cap = int(pltpu.get_tpu_info().vmem_capacity_bytes)
        return min(100 << 20, (cap * 3) // 4)
    except Exception:
        return 32 << 20


def first_layers_forward(state, cont_data, cat_data, *, tb=None):
    """Pallas implementation of FirstLayers.forward (eval mode)."""
    if state["n_cat"] == 0:
        return cont_data  # module returns cont_data unchanged when there are no embeddings

    B = int(cat_data.shape[0])
    nc = state["no_of_cont"]
    n_cat = state["n_cat"]
    total = state["total"]
    k_total = state["k_total"]
    w = state["w"]

    # Batch tile: multiple of 8 sublanes, capped at 256 so the [TB, K] one-hot and
    # LHS stay well inside the vreg file (no spills), and split so the grid has at
    # least 2 tiles when possible (both v7x TensorCores + writeback pipelining).
    if tb is None:
        tb = min(256, max(8, _round_up((B + 1) // 2, 8)))
    b_pad = _round_up(B, tb)

    cat_in = cat_data.astype(jnp.int32)
    if b_pad != B:
        cat_in = jnp.pad(cat_in, ((0, b_pad - B), (0, 0)))

    operands = [cat_in]
    in_specs = [pl.BlockSpec((tb, n_cat), lambda b: (b, 0))]
    if nc:
        cont_in = cont_data.astype(jnp.float32)
        if b_pad != B:
            cont_in = jnp.pad(cont_in, ((0, b_pad - B), (0, 0)))
        operands.append(cont_in)
        in_specs.append(pl.BlockSpec((tb, nc), lambda b: (b, 0)))
    operands.append(w)
    in_specs.append(pl.BlockSpec((k_total, total), lambda b: (0, 0)))  # resident constant block

    # Output block is the true width `total` (full last dim) — no 128-padding of
    # HBM writes and no wrapper-side column slice.
    out_spec = pl.BlockSpec((tb, total), lambda b: (b, 0))

    itemsize_w = jnp.dtype(state["dot_dtype"]).itemsize
    tile_bytes = 4 * tb * (n_cat + nc + total)          # I/O tiles (i32/f32), per buffer
    interm_bytes = 16 * tb * k_total                    # iota / mask / lhs intermediates
    needed = 2 * tile_bytes + 2 * itemsize_w * k_total * total + interm_bytes + (2 << 20)
    vmem_limit = int(min(max(needed, 16 << 20), _vmem_cap_bytes()))

    kernel = functools.partial(
        _first_layers_kernel,
        vocab_offsets=state["vocab_offsets"],
        k_total=k_total,
        no_of_cont=nc,
        dot_dtype=state["dot_dtype"],
    )

    out = pl.pallas_call(
        kernel,
        out_shape=jax.ShapeDtypeStruct((b_pad, total), jnp.float32),
        grid=(b_pad // tb,),
        in_specs=in_specs,
        out_specs=out_spec,
        compiler_params=pltpu.CompilerParams(
            dimension_semantics=("parallel",),
            vmem_limit_bytes=vmem_limit,
        ),
    )(*operands)

    return out if b_pad == B else out[:B]


def first_layers_reference(cont_data, cat_data, emb_tables, cast=None):
    """Pure-JAX reference. If `cast` is given, values are rounded to that dtype
    (to check the bf16 MXU path bit-for-bit)."""
    tables = emb_tables
    cont = cont_data
    if cast is not None:
        tables = [t.astype(cast).astype(jnp.float32) for t in tables]
        cont = cont.astype(cast).astype(jnp.float32)
    embs = [jnp.take(t, cat_data[:, i], axis=0) for i, t in enumerate(tables)]
    return jnp.concatenate(embs + [cont], axis=1)


if __name__ == "__main__":
    # Small, deterministic synthetic configuration (mirrors FirstLayers.__init__):
    emb_dims = [(10, 4), (6, 8), (12, 16)]   # -> no_of_embs = 28
    no_of_cont = 5
    B = 32                                   # gives a 2-tile grid (tb = 16)

    key = jax.random.PRNGKey(0)
    k_tab, k_cont, k_cat = jax.random.split(key, 3)

    emb_tables = make_first_layers_params(k_tab, emb_dims)
    cont_data = jax.random.normal(k_cont, (B, no_of_cont), dtype=jnp.float32)
    cat_cols = []
    for i, (v, _) in enumerate(emb_dims):
        cat_cols.append(jax.random.randint(jax.random.fold_in(k_cat, i), (B, 1), 0, v,
                                           dtype=jnp.int32))
    cat_data = jnp.concatenate(cat_cols, axis=1)  # [B, n_cat] int32

    # Build fused gather weight once (bf16 MXU path by default; pass
    # dot_dtype=jnp.float32 for exact f32 parity at ~3x MXU cost).
    state = make_first_layers_state(emb_tables, no_of_cont)

    out = first_layers_forward(state, cont_data, cat_data)
    out = jax.block_until_ready(out)

    total = sum(d for _, d in emb_dims) + no_of_cont
    assert out.shape == (B, total)

    # Tight check vs a bf16-rounded reference (the one-hot selection is exact; only
    # the single bf16 cast of table/cont values differs), plus a looser check vs
    # the full-f32 module semantics.
    ref_bf16 = first_layers_reference(cont_data, cat_data, emb_tables, cast=jnp.bfloat16)
    ref_f32 = first_layers_reference(cont_data, cat_data, emb_tables)
    assert jnp.allclose(out, ref_bf16, atol=1e-5, rtol=1e-5)
    assert jnp.allclose(out, ref_f32, atol=2e-2, rtol=2e-2)

    print("KERNEL_OK")
</pallas_src>

<mosaic_0001>
module attributes {stable_mosaic.version = 11 : i64} {
  func.func @_first_layers_kernel(%arg0: i32, %arg1: memref<16x3xi32, #tpu.memory_space<vmem>>, %arg2: memref<16x5xf32, #tpu.memory_space<vmem>>, %arg3: memref<33x33xbf16, #tpu.memory_space<vmem>>, %arg4: memref<16x33xf32, #tpu.memory_space<vmem>>) attributes {dimension_semantics = [#tpu.dimension_semantics<parallel>], iteration_bounds = array<i64: 2>, scalar_prefetch = 0 : i64, scratch_operands = 0 : i64, tpu.core_type = #tpu.core_type<tc>, window_params = [{transform_indices = @transform_0, window_bounds = array<i64: 16, 3>}, {transform_indices = @transform_1, window_bounds = array<i64: 16, 5>}, {pipeline_mode = #tpu.pipeline_mode<synchronous>, transform_indices = @transform_2, window_bounds = array<i64: 33, 33>}, {transform_indices = @transform_3, window_bounds = array<i64: 16, 33>}]} {
    %c0 = arith.constant 0 : index
    %c0_0 = arith.constant 0 : index
    %0 = vector.load %arg1[%c0, %c0_0] : memref<16x3xi32, #tpu.memory_space<vmem>>, vector<16x3xi32>
    %1 = tpu.iota {dimensions = array<i32: 1>} : vector<16x33xi32>
    %2 = vector.extract_strided_slice %0 {offsets = [0, 0], sizes = [16, 1], strides = [1, 1]} : vector<16x3xi32> to vector<16x1xi32>
    %c5_i32 = arith.constant 5 : i32
    %3 = vector.broadcast %c5_i32 : i32 to vector<16x1xi32>
    %4 = arith.addi %2, %3 : vector<16x1xi32>
    %5 = vector.broadcast %4 : vector<16x1xi32> to vector<16x33xi32>
    %6 = arith.cmpi eq, %5, %1 : vector<16x33xi32>
    %7 = vector.extract_strided_slice %0 {offsets = [0, 1], sizes = [16, 1], strides = [1, 1]} : vector<16x3xi32> to vector<16x1xi32>
    %c15_i32 = arith.constant 15 : i32
    %8 = vector.broadcast %c15_i32 : i32 to vector<16x1xi32>
    %9 = arith.addi %7, %8 : vector<16x1xi32>
    %10 = vector.broadcast %9 : vector<16x1xi32> to vector<16x33xi32>
    %11 = arith.cmpi eq, %10, %1 : vector<16x33xi32>
    %12 = arith.ori %6, %11 : vector<16x33xi1>
    %13 = vector.extract_strided_slice %0 {offsets = [0, 2], sizes = [16, 1], strides = [1, 1]} : vector<16x3xi32> to vector<16x1xi32>
    %c21_i32 = arith.constant 21 : i32
    %14 = vector.broadcast %c21_i32 : i32 to vector<16x1xi32>
    %15 = arith.addi %13, %14 : vector<16x1xi32>
    %16 = vector.broadcast %15 : vector<16x1xi32> to vector<16x33xi32>
    %17 = arith.cmpi eq, %16, %1 : vector<16x33xi32>
    %18 = arith.ori %12, %17 : vector<16x33xi1>
    %c0_1 = arith.constant 0 : index
    %c0_2 = arith.constant 0 : index
    %19 = vector.load %arg2[%c0_1, %c0_2] : memref<16x5xf32, #tpu.memory_space<vmem>>, vector<16x5xf32>
    %cst = arith.constant 0.000000e+00 : f32
    %20 = vector.broadcast %cst : f32 to vector<16x28xf32>
    %21 = tpu.concatenate %19, %20 in 1 : vector<16x5xf32>, vector<16x28xf32> -> vector<16x33xf32>
    %cst_3 = arith.constant 1.000000e+00 : f32
    %22 = vector.broadcast %cst_3 : f32 to vector<16x33xf32>
    %23 = arith.select %18, %22, %21 : vector<16x33xi1>, vector<16x33xf32>
    %24 = arith.truncf %23 : vector<16x33xf32> to vector<16x33xbf16>
    %c0_4 = arith.constant 0 : index
    %c0_5 = arith.constant 0 : index
    %25 = vector.load %arg3[%c0_4, %c0_5] : memref<33x33xbf16, #tpu.memory_space<vmem>>, vector<33x33xbf16>
    %cst_6 = arith.constant dense<0.000000e+00> : vector<16x33xf32>
    %26 = tpu.matmul %24, %25, %cst_6 {dimension_numbers = #tpu.dot_dimension_numbers<[1], [0], [0], [1], [0, 0, 1, 1], [], []>} : vector<16x33xbf16>, vector<33x33xbf16>, vector<16x33xf32> -> vector<16x33xf32>
    %c0_7 = arith.constant 0 : index
    %c0_8 = arith.constant 0 : index
    %27 = vector.load %arg4[%c0_7, %c0_8] : memref<16x33xf32, #tpu.memory_space<vmem>>, vector<16x33xf32>
    tpu.vector_store %arg4[%c0_7, %c0_8], %26 {strides = array<i32>} : memref<16x33xf32, #tpu.memory_space<vmem>>, vector<16x33xf32>,
    return
  }
  func.func @transform_0(%arg0: i32) -> (i32, i32) {
    %c0_i32 = arith.constant 0 : i32
    %c0_i32_0 = arith.constant 0 : i32
    return %arg0, %c0_i32 : i32, i32
  }
  func.func @transform_1(%arg0: i32) -> (i32, i32) {
    %c0_i32 = arith.constant 0 : i32
    %c0_i32_0 = arith.constant 0 : i32
    return %arg0, %c0_i32 : i32, i32
  }
  func.func @transform_2(%arg0: i32) -> (i32, i32) {
    %c0_i32 = arith.constant 0 : i32
    %c0_i32_0 = arith.constant 0 : i32
    %c0_i32_1 = arith.constant 0 : i32
    return %c0_i32, %c0_i32_0 : i32, i32
  }
  func.func @transform_3(%arg0: i32) -> (i32, i32) {
    %c0_i32 = arith.constant 0 : i32
    %c0_i32_0 = arith.constant 0 : i32
    return %arg0, %c0_i32 : i32, i32
  }
}

</mosaic_0001>

<bundles_post_ra>
// kernel: tpu_custom_call.1
= control target key start
LH: loop header
LB: loop body
LE: loop exit
PB: predicated region body
PF: predicated region fallthrough
CT: control target
= control target key end

     0   :  { %8 = vsyncpa [#allocation3], 0  ;;  %s698_s0 = inlined_call_operand.vmem [shape: s32[32,3], index: 0, kind: input, shape index: {}]   ;;  %s699_s1 = inlined_call_operand.vmem [shape: f32[32,5], index: 1, kind: input, shape index: {}]   ;;  %s700_s2 = inlined_call_operand.vmem [shape: bf16[33,33], index: 2, kind: input, shape index: {}]   ;;  %s701_s3 = inlined_call_operand.hbm [shape: f32[32,33], index: 3, kind: output, shape index: {}]  }
   0x1   :  { %10 = vsyncpa [#allocation3 + $0x1], 0  ;;  %s578_s12 = smov 0   ;;  %s580_s13 = smov 0  }
   0x2   :  { %s582_s14 = smov 0   ;;  %s584_s15 = smov 0  }
   0x3 LB: > { %s599_s16 = sadd.s32 4294967295, %s548_s15   ;;  %s402_s17 = sadd.s32 4294967294, %s548_s15   ;;  %s548_s15 = sphi %s584_s15, %s707_s15   ;;  %s544_s14 = sphi %s582_s14, %s706_s14   ;;  %s540_s13 = sphi %s580_s13, %s705_s13   ;;  %s536_s12 = sphi %s578_s12, %s704_s12  }
   0x4   : > { %s603_s18 = sadd.s32 1, %s548_s15   ;;  %s96_s19 = sadd.s32 1, %s544_s14 }
   0x5   : > { %s93_s20 = ssub.s32 %s548_s15, %s603_s18  ;;  %p106_p0 = scmp.ne.s32.totalorder %s544_s14, %s540_s13 }
   0x6   : > { %p94_p1 = scmp.eq.s32.totalorder %s93_s20, 0  ;;  %p107_p2 = scmp.eq.s32.totalorder %s599_s16, 1 }
   0x7   : > { %p112_p3 = scmp.ne.s32.totalorder %s540_s13, %s536_s12  ;;  %p113_p4 = scmp.eq.s32.totalorder %s402_s17, 1 }
   0x8   : > { %s614_s21 = scalar_select %p94_p1, %s544_s14, %s96_s19  }
   0x9   : > { %p616_p5 = por %p107_p2, %p106_p0  ;;  %p620_p6 = por %p113_p4, %p112_p3 }
   0xa   : > { %p405_p7 = scmp.ge.s32.totalorder %s548_s15, 1  ;;  %p152_p8 = scmp.lt.s32.totalorder %s548_s15, 3 }
   0xc   : > { %p153_p9 = pnand %p405_p7, %p152_p8 }
   0xd   : > { %s407_s24 = sshll.u32 (!%p153_p9), %s599_s16, 1  ;;  %s178_s11 = sand.u32 (!%p153_p9), 1, %s540_s13  }
   0xe   : > { %156 = sbr.rel (%p153_p9) target bundleno = 376 (0x178), region = 32  ;;  %p182_p10 = scmp.lt.s32.totalorder (!%p153_p9), %s407_s24, 3 }
   0xf   : > { %s406_s17 = sshll.u32 (!%p153_p9), %s178_s11, 4  ;;  %s658_s28 = scalar_lea.sflag (!%p153_p9), [#allocation3], %s178_s11 }
  0x10   : > { %s180_s19 = scalar_lea.vmem (!%p153_p9), [#allocation2], %s406_s17 }
  0x11   : > { %s328_s20 = sshll.u32 (!%p153_p9), %s180_s19, 4  ;;  %s651_s20 = int_to_ptr.vmem [resolvable:$true] %s328_s20 }
  0x12   : > { %s488_s29 = scalar_lea.vmem (!%p153_p9), %s651_s20, 256 }
  0x13   : > { %v550_v0 = vmov 1   ;;  %vm265_vm0 = vcmask 1040384   ;;  %v551_v1 = vmov 0   ;;  %s709_s24 = smov (!%p182_p10, %s407_s24), 3  ;;  %v552_v9 = vmov 0.0   ;;  %v486_v12 = vld [vmem:[%s700_s2 + $0x8] sm:$0xff]   ;;  %p489_p11 = scmp.ne.s32.totalorder %s651_s20, %s488_s29 }
  0x14   : > { %482 = vset.pattern.permute.xlu1 %v550_v0  ;;  %481 = vset.pattern.permute.xlu0 %v551_v1  ;;  %v267_v2 = vsel %vm265_vm0, 65535, %v551_v1  ;;  %s408_s25 = sshll.u32 %s709_s24, 3  ;;  %v485_v3 = vld [vmem:[%s700_s2 + $0x10] ss:$0 sps:$4 sm:$0x11]   ;;  %v487_v15 = vld [vmem:[%s700_s2] sm:$0xff]   ;;  %v197_v17 = vlaneseq }
  0x15   : > { %s185_s30 = scalar_lea.vmem %s698_s0, %s408_s25  ;;  %v269_v6 = vand.u32 %v485_v3, %v267_v2  ;;  %425 = vmatprep.subr.bf16.mxu0 %v552_v9  ;;  %v553_v16 = vmov 2   ;;  %vm554_vm1 = vmmov 0   ;;  %s191_s10 = scalar_lea.vmem %s699_s1, %s408_s25  ;;  %vm235_vm4 = vcmask 39936  }
  0x16   : > { %v195_v4 = vld [vmem:[%s185_s30] sm:$0xff]  ;;  %v196_v5 = vld [vmem:[%s185_s30 + $0x8] sm:$0xff]  ;;  %431 = vmatprep.mubr.msk.bf16.mxu0 %vm554_vm1, %v552_v9  ;;  %v198_v20 = vand.u32 127, %v197_v17  ;;  %vm261_vm13 = vcmask 269312   ;;  %s420_s24 = sshll.u32 %s599_s16, 8  ;;  %p490_p12 = pnand %p489_p11, %p616_p5 }
  0x17   : > { %v209_v7 = vadd.s32 15, %v195_v4  ;;  %v199_v8 = vadd.s32 5, %v195_v4  ;;  %426 = vmatpush3.bf16.msra.mxu0 %v269_v6  ;;  %v210_v10 = vadd.s32 15, %v196_v5  ;;  %v200_v11 = vadd.s32 5, %v196_v5  ;;  %v234_v23 = vld [vmem:[%s191_s10 + $0x8] sm:$0xff]  ;;  %v233_v24 = vld [vmem:[%s191_s10] sm:$0xff]  ;;  %s656_s27 = scalar_lea.hbm %s701_s3, %s420_s24 }
  0x18   : > { %427 = vmatprep.subr.bf16.mxu0 %v552_v9  ;;  %v222_v13 = vadd.s32 21, %v196_v5  ;;  %v221_v14 = vadd.s32 21, %v195_v4  ;;  %v237_v25 = vsel %vm235_vm4, %v234_v23, 0.0  ;;  %v236_v28 = vsel %vm235_vm4, %v233_v24, 0.0  ;;  %p491_p13 = pneg %p490_p12  ;;  %s555_s16 = smov [#allocation2]  }
  0x19   : > { %212 = vperm.xlu1 %482, %v209_v7   ;;  %202 = vperm.xlu0 %481, %v199_v8   ;;  %s492_s30 = sshll.u32 %s555_s16, 4  ;;  %s493_s30 = int_to_ptr.vmem [resolvable:$false] %s492_s30 }
  0x1a   : > { %s494_s4 = scalar_lea.vmem %s493_s30, 512  ;;  %p495_p0 = scmp.lt.s32.totalorder %s651_s20, %s493_s30 }
  0x1b   : > { %428 = vmatpush3.bf16.msra.mxu0 %v486_v12  ;;  %p496_p1 = scmp.lt.s32.totalorder %s494_s4, %s488_s29 }
  0x1c   : > { %429 = vmatprep.subr.bf16.mxu0 %v552_v9 }
  0x1d   : > { %215 = vperm.xlu1 %482, %v210_v10   ;;  %205 = vperm.xlu0 %481, %v200_v11   ;;  %p497_p2 = por %p496_p1, %p495_p0 }
  0x1f   : > { %430 = vmatpush3.bf16.msra.mxu0 %v487_v15  ;;  %p498_p3 = pnand %p497_p2, %p491_p13 }
  0x21   : > { %484 = vset.pattern.permute.xlu1 %v553_v16  ;;  %483 = vset.pattern.permute.xlu0 %v553_v16 }
  0x22   : > { %227 = vperm.xlu1 %484, %v222_v13   ;;  %224 = vperm.xlu0 %483, %v221_v14  }
  0x94   : > { %v213_v18 = vpop.permute.xlu1 %212  ;;  %v203_v19 = vpop.permute.xlu0 %202 }
  0x95   : > { %vm217_vm2 = vcmp.eq.s32.totalorder %v213_v18, %v198_v20  ;;  %vm207_vm3 = vcmp.eq.s32.totalorder %v203_v19, %v198_v20 }
  0x96   : > { %vm219_vm7 = vmor %vm207_vm3, %vm217_vm2 }
  0x98   : > { %v216_v21 = vpop.permute.xlu1 %215  ;;  %v206_v22 = vpop.permute.xlu0 %205 }
  0x99   : > { %vm218_vm5 = vcmp.eq.s32.totalorder %v216_v21, %v198_v20  ;;  %vm208_vm6 = vcmp.eq.s32.totalorder %v206_v22, %v198_v20 }
  0x9a   : > { %vm220_vm8 = vmor %vm208_vm6, %vm218_vm5 }
  0x9d   : > { %v228_v26 = vpop.permute.xlu1 %227  ;;  %v225_v27 = vpop.permute.xlu0 %224 }
  0x9e   : > { %vm230_vm9 = vcmp.eq.s32.totalorder %v228_v26, %v198_v20  ;;  %vm229_vm10 = vcmp.eq.s32.totalorder %v225_v27, %v198_v20 }
  0x9f   : > { %vm232_vm11 = vmor %vm220_vm8, %vm230_vm9 }
  0xa0   : > { %v239_v29 = vsel %vm232_vm11, 1.0, %v237_v25  ;;  %vm231_vm12 = vmor %vm219_vm7, %vm229_vm10 }
  0xa1   : > { %v238_v30 = vsel %vm231_vm12, 1.0, %v236_v28 }
  0xa2   : > { %v240_v31 = vpack.c.bf16 %v239_v29, %v238_v30 }
  0xa4   : > { %432 = vmatmul.mubr.msk.bf16.vlgmr.msra.gmra.mxu0 %vm261_vm13, %v240_v31 }
 0x164   : > { %v305_v32 = vpop.f32.mrf.mxu0 }
 0x165   : > { %312 = vst.msk [vmem:[%s180_s19] sm:$0xff] %vm261_vm13, %v305_v32 }
 0x166   : > { %v433_v33 = vpop.f32.mrf.mxu0 }
 0x168   : > { %v308_v34 = vpop.f32.mrf.mxu0 }
 0x169   : > { %313 = vst.msk [vmem:[%s180_s19 + $0x8] sm:$0xff] %vm261_vm13, %v308_v34 }
 0x16a   : > { %v434_v35 = vpop.f32.mrf.mxu0 }
 0x16b   : > { %501 = shalt.err (!%p498_p3)
}
 0x16c   : > { %s502_s5 = scalar_lea.hbm %s656_s27, 256  ;;  %s506_s8 = scalar_lea.hbm %s701_s3, 512 }
 0x16d   : > { %p503_p4 = scmp.ne.s32.totalorder %s656_s27, %s502_s5  ;;  %p507_p9 = scmp.lt.s32.totalorder %s656_s27, %s701_s3 }
 0x16e   : > { %p508_p10 = scmp.lt.s32.totalorder %s506_s8, %s502_s5 }
 0x16f   : > { %p504_p7 = pnand %p503_p4, %p616_p5 }
 0x170   : > { %p509_p11 = por %p508_p10, %p507_p9 }
 0x171   : > { %p505_p8 = pneg %p504_p7 }
 0x173   : > { %p510_p12 = pnand %p509_p11, %p505_p8 }
 0x175   : > { %513 = shalt.err (!%p510_p12)
}
 0x176   : > { %s556_s11 = smov 128   ;;  %s557_s17 = smov 8  }
 0x177   : > { %435 = dma.vmem_to_hbm [thread:$0]  (%p616_p5), %s651_s20, 256, %s656_s27, %s658_s28, %s556_s11, %s556_s11, %s557_s17  }
 0x178 PF: > { %p441_p13 = scmp.ge.s32.totalorder %s548_s15, 2  ;;  %s343_s19 = sand.u32 1, %s536_s12  }
 0x179   : > { %s344_s24 = scalar_lea.sflag [#allocation3], %s343_s19 }
 0x17a   : > { %p438_p0 = pnand %p441_p13, %p620_p6 }
 0x17c   : > { %p439_p1 = pneg %p438_p0 }
 0x17e   : > { %531 = dma.done.wait (%p439_p1), %s344_s24, 256  }
 0x17f   : > { %533 = vsyncadd (%p439_p1), %s344_s24, 4294967040  ;;  %p13_p2 = scmp.ge.s32.totalorder %s603_s18, 4   ;;  %s704_s12 = smov %s540_s13 }
 0x180   : > { %s705_s13 = smov %s544_s14  ;;  %s706_s14 = smov %s614_s21 }
 0x181   : > { %s707_s15 = smov %s603_s18  ;;  %15 = sbr.rel (!%p13_p2) target bundleno = 3 (0x3), region = 70 }
 0x186   :  { %349 = vsyncpa [#allocation3], 1 }
 0x187   :  { %351 = vsyncpa [#allocation3 + $0x1], 1 }

</bundles_post_ra>
